<compile_context>
chip_gen: v5e
topology: v5e:2x2
jax: 0.10.0
libtpu: 0.0.40
codegen_flags: <defaults>
</compile_context>

<pallas_src>
import functools

import numpy as np
import jax
import jax.numpy as jnp
from jax.experimental import pallas as pl
from jax.experimental.pallas import tpu as pltpu


_CP = pltpu.CompilerParams(dimension_semantics=("parallel",))


# ----------------------------------------------------------------------------
# Kernel A: ConvTranspose2d(in_size, out_size, k=2, s=2, bias=True)
#           -> one matmul per image; taps packed on the lane axis and stored in
#              pixel-shuffled (H, 2, W, 2*Cout) layout (contiguous-reshape-able
#              to the (2H, 2W, Cout) NHWC image).
# ----------------------------------------------------------------------------
def _deconv2x2_kernel(x_ref, w_ref, b_ref, o_ref):
    _, H, W, Cin = x_ref.shape
    twoC = o_ref.shape[4]                                   # 2 * Cout
    x2d = x_ref[0].reshape(H * W, Cin).astype(jnp.float32)
    y = jnp.dot(x2d, w_ref[...].astype(jnp.float32),
                preferred_element_type=jnp.float32)
    y = y + b_ref[...].astype(jnp.float32)                  # (H*W, 4*Cout)
    for di in range(2):                                     # static unroll
        # columns [di*2*Cout, (di+1)*2*Cout) are ordered (dj, cout) -> exactly
        # the minor-dim layout of the pixel-shuffled output.
        o_ref[0, :, di, :, :] = (
            y[:, di * twoC:(di + 1) * twoC]
            .reshape(H, W, twoC).astype(o_ref.dtype))


# ----------------------------------------------------------------------------
# Kernel B: fused  concat -> upchannel conv -> LayerNorm -> conv+LeakyReLU
#                  -> conv -> residual add
# ----------------------------------------------------------------------------
def _fused_block_kernel(up_ref, br_ref, wuc_ref, buc_ref, lns_ref,
                        w1_ref, b1_ref, w2_ref, b2_ref,
                        o_ref, cat_sc, tpad_sc, patch_sc, y_sc, *, slope, eps):
    f32 = jnp.float32
    _, Ho, Wo, Cout = o_ref.shape
    Ctot = cat_sc.shape[-1]
    P = Ho * Wo

    # Zero-padded concat([up, bridge], channel), built directly in VMEM
    # (in-kernel padding: no jnp.pad / jnp.concatenate HBM passes).
    # Zeroed every grid step so the borders are valid on every megacore shard.
    cat_sc[...] = jnp.zeros_like(cat_sc)
    tpad_sc[...] = jnp.zeros_like(tpad_sc)
    cat_sc[1:Ho + 1, 1:Wo + 1, 0:Cout] = up_ref[0].astype(f32)
    cat_sc[1:Ho + 1, 1:Wo + 1, Cout:Ctot] = br_ref[0].astype(f32)

    def conv3x3(src_ref, Cc, w_r, b_r):
        # im2col patch (P, 9*Cc) assembled in VMEM scratch, then ONE MXU matmul
        # with K = 9*Cc (instead of 9 small-K dots + VPU accumulation).
        for ky in range(3):
            for kx in range(3):
                k = ky * 3 + kx
                patch_sc[:, k * Cc:(k + 1) * Cc] = (
                    src_ref[ky:ky + Ho, kx:kx + Wo, :].reshape(P, Cc))
        return (jnp.dot(patch_sc[:, 0:9 * Cc], w_r[...].astype(f32),
                        preferred_element_type=f32)
                + b_r[...].astype(f32))

    # upchannel Conv2d(in_size -> out_size); also the residual input
    y = conv3x3(cat_sc, Ctot, wuc_ref, buc_ref)            # (P, Cout) f32
    y_sc[...] = y

    # LayerNorm 'WithBias' over channels (biased variance).  gamma is folded
    # into w1 (exact); beta/gamma is added here (cannot be folded into b1
    # exactly because of the zero-padded conv borders).
    mu = jnp.mean(y, axis=-1, keepdims=True)
    var = jnp.mean((y - mu) ** 2, axis=-1, keepdims=True)
    t = (y - mu) * jax.lax.rsqrt(var + eps) + lns_ref[...].astype(f32)

    tpad_sc[1:Ho + 1, 1:Wo + 1, :] = t.reshape(Ho, Wo, Cout)
    h = conv3x3(tpad_sc, Cout, w1_ref, b1_ref)
    h = jnp.where(h >= 0, h, h * slope)                    # LeakyReLU(relu_slope)
    tpad_sc[1:Ho + 1, 1:Wo + 1, :] = h.reshape(Ho, Wo, Cout)   # border stays zero
    h = conv3x3(tpad_sc, Cout, w2_ref, b2_ref)

    o_ref[0] = (h + y_sc[...]).reshape(Ho, Wo, Cout).astype(o_ref.dtype)


# ----------------------------------------------------------------------------
# UNetUpBlock forward (block_type='res', use_curve=False, no mask/mask_fn/xs)
# ----------------------------------------------------------------------------
def unet_up_block_forward(x, bridge, params, relu_slope, eps=1e-5):
    N, H, W, Cin = x.shape
    Cout = params["w_up"].shape[-1]
    Cb = bridge.shape[-1]
    Ho, Wo = 2 * H, 2 * W
    Ctot = Cout + Cb
    assert bridge.shape == (N, Ho, Wo, Cb) and Ctot == Cin

    # ---- one-time parameter packing (cheap XLA glue, not per-pixel work) ----
    # deconv taps (k = di*2 + dj) packed on the output-column axis
    w_up_p = jnp.transpose(params["w_up"], (1, 0, 2)).reshape(Cin, 4 * Cout)
    b_up_p = jnp.tile(params["b_up"], 4).reshape(1, 4 * Cout)
    w_uc_p = params["w_uc"].reshape(9 * Ctot, Cout)
    b_uc_p = params["b_uc"].reshape(1, Cout)
    # LayerNorm gamma folded into conv1 weights (exact algebra, gamma != 0)
    w1_p = (params["w1"] * params["ln_g"][None, :, None]).reshape(9 * Cout, Cout)
    lns_p = (params["ln_b"] / params["ln_g"]).reshape(1, Cout)
    b1_p = params["b1"].reshape(1, Cout)
    w2_p = params["w2"].reshape(9 * Cout, Cout)
    b2_p = params["b2"].reshape(1, Cout)

    # (A) deconv: one matmul per image, output stored already pixel-shuffled
    up_shuf = pl.pallas_call(
        _deconv2x2_kernel,
        out_shape=jax.ShapeDtypeStruct((N, H, 2, W, 2 * Cout), x.dtype),
        grid=(N,),
        in_specs=[
            pl.BlockSpec((1, H, W, Cin), lambda n: (n, 0, 0, 0)),
            pl.BlockSpec((Cin, 4 * Cout), lambda n: (0, 0)),
            pl.BlockSpec((1, 4 * Cout), lambda n: (0, 0)),
        ],
        out_specs=pl.BlockSpec((1, H, 2, W, 2 * Cout), lambda n: (n, 0, 0, 0, 0)),
        compiler_params=_CP,
    )(x, w_up_p, b_up_p)

    # Metadata-only reshape: (N,H,2,W,2*Cout) row-major == (N,2H,2W,Cout).
    up = up_shuf.reshape(N, Ho, Wo, Cout)

    # (B) fused post-deconv chain, all intermediates resident in VMEM scratch.
    # TODO(synk): for large H*W add a spatially tiled grid with 1-row halos per
    # tile (and bf16 activation feeds on v6e/v7x) sized for v7x's 64 MiB VMEM;
    # for very small channel counts a W-on-lanes layout would use lanes better.
    out = pl.pallas_call(
        functools.partial(_fused_block_kernel, slope=relu_slope, eps=eps),
        out_shape=jax.ShapeDtypeStruct((N, Ho, Wo, Cout), x.dtype),
        grid=(N,),
        in_specs=[
            pl.BlockSpec((1, Ho, Wo, Cout), lambda n: (n, 0, 0, 0)),   # up
            pl.BlockSpec((1, Ho, Wo, Cb), lambda n: (n, 0, 0, 0)),     # bridge
            pl.BlockSpec((9 * Ctot, Cout), lambda n: (0, 0)),          # w_uc
            pl.BlockSpec((1, Cout), lambda n: (0, 0)),                 # b_uc
            pl.BlockSpec((1, Cout), lambda n: (0, 0)),                 # ln beta/gamma
            pl.BlockSpec((9 * Cout, Cout), lambda n: (0, 0)),          # w1 (gamma-folded)
            pl.BlockSpec((1, Cout), lambda n: (0, 0)),                 # b1
            pl.BlockSpec((9 * Cout, Cout), lambda n: (0, 0)),          # w2
            pl.BlockSpec((1, Cout), lambda n: (0, 0)),                 # b2
        ],
        out_specs=pl.BlockSpec((1, Ho, Wo, Cout), lambda n: (n, 0, 0, 0)),
        scratch_shapes=[
            pltpu.VMEM((Ho + 2, Wo + 2, Ctot), jnp.float32),   # padded concat image
            pltpu.VMEM((Ho + 2, Wo + 2, Cout), jnp.float32),   # padded t image
            pltpu.VMEM((Ho * Wo, 9 * Ctot), jnp.float32),      # im2col patch
            pltpu.VMEM((Ho * Wo, Cout), jnp.float32),          # residual y
        ],
        compiler_params=_CP,
    )(up, bridge, w_uc_p, b_uc_p, lns_p, w1_p, b1_p, w2_p, b2_p)
    return out


# ----------------------------------------------------------------------------
# Pure-JAX reference (lax.conv, HIGHEST precision) for correctness check
# ----------------------------------------------------------------------------
def ref_forward(x, bridge, params, relu_slope):
    N, H, W, _ = x.shape
    Cout = params["w_up"].shape[-1]
    up = jnp.einsum("nhwc,kcd->nhwkd", x, params["w_up"],
                    precision=jax.lax.Precision.HIGHEST) + params["b_up"]
    up = up.reshape(N, H, W, 2, 2, Cout).transpose(0, 1, 3, 2, 4, 5)
    up = up.reshape(N, 2 * H, 2 * W, Cout)
    cat = jnp.concatenate([up, bridge], axis=-1)

    def conv_ref(z, w, b, slope=None):
        w4 = w.reshape(3, 3, z.shape[-1], -1)
        y = jax.lax.conv_general_dilated(
            z, w4, (1, 1), "SAME",
            dimension_numbers=("NHWC", "HWIO", "NHWC"),
            precision=jax.lax.Precision.HIGHEST) + b
        if slope is not None:
            y = jnp.where(y >= 0, y, y * slope)
        return y

    y = conv_ref(cat, params["w_uc"], params["b_uc"])
    mu = y.mean(-1, keepdims=True)
    var = ((y - mu) ** 2).mean(-1, keepdims=True)
    t = (y - mu) / jnp.sqrt(var + 1e-5) * params["ln_g"] + params["ln_b"]
    t = conv_ref(t, params["w1"], params["b1"], slope=relu_slope)
    t = conv_ref(t, params["w2"], params["b2"])
    return t + y


if __name__ == "__main__":
    key = jax.random.PRNGKey(0)
    ks = jax.random.split(key, 12)

    N, H, W = 2, 16, 16
    in_size, out_size = 8, 4          # in_size = 2 * out_size (bridge has out_size ch)
    relu_slope = 0.2

    # inputs (NHWC; PyTorch NCHW x:(2,8,16,16) <-> here (2,16,16,8))
    x = jax.random.normal(ks[0], (N, H, W, in_size), jnp.float32)
    bridge = jax.random.normal(ks[1], (N, 2 * H, 2 * W, out_size), jnp.float32)

    # deterministic synthetic parameters (shapes implied by module __init__)
    params = {
        # ConvTranspose2d(in_size, out_size, 2, 2, bias=True): (4, Cin, Cout), k=di*2+dj
        "w_up": jax.random.normal(ks[2], (4, in_size, out_size), jnp.float32) * 0.15,
        "b_up": jax.random.normal(ks[3], (out_size,), jnp.float32) * 0.1,
        # upchannel Conv2d(in_size, out_size, 3, padding=1, bias=True): (9, Cin, Cout)
        "w_uc": jax.random.normal(ks[4], (9, in_size, out_size), jnp.float32) * 0.1,
        "b_uc": jax.random.normal(ks[5], (out_size,), jnp.float32) * 0.1,
        # LayerNorm(out_size, 'WithBias')
        "ln_g": 1.0 + 0.1 * jax.random.normal(ks[6], (out_size,), jnp.float32),
        "ln_b": 0.1 * jax.random.normal(ks[7], (out_size,), jnp.float32),
        # res-block convs Conv2d(out_size, out_size, 3, padding=1, bias=True)
        "w1": jax.random.normal(ks[8], (9, out_size, out_size), jnp.float32) * 0.1,
        "b1": jax.random.normal(ks[9], (out_size,), jnp.float32) * 0.1,
        "w2": jax.random.normal(ks[10], (9, out_size, out_size), jnp.float32) * 0.1,
        "b2": jax.random.normal(ks[11], (out_size,), jnp.float32) * 0.1,
    }

    out = unet_up_block_forward(x, bridge, params, relu_slope)
    out = jax.block_until_ready(out)
    assert out.shape == (N, 2 * H, 2 * W, out_size)

    ref = jax.block_until_ready(ref_forward(x, bridge, params, relu_slope))
    # Tolerance covers the MXU f32 matmul precision policy of the in-kernel dots
    # (default precision) vs. the HIGHEST-precision XLA reference; typical
    # observed error with full-f32 MXU passes is <1e-4.
    np.testing.assert_allclose(np.asarray(out), np.asarray(ref),
                               rtol=2e-2, atol=2e-2)

    print("KERNEL_OK")
</pallas_src>

<mosaic_0001>
module attributes {stable_mosaic.version = 11 : i64} {
  func.func @_deconv2x2_kernel(%arg0: i32, %arg1: memref<1x16x16x8xf32, #tpu.memory_space<vmem>>, %arg2: memref<8x16xf32, #tpu.memory_space<vmem>>, %arg3: memref<1x16xf32, #tpu.memory_space<vmem>>, %arg4: memref<1x16x2x16x8xf32, #tpu.memory_space<vmem>>) attributes {dimension_semantics = [#tpu.dimension_semantics<parallel>], iteration_bounds = array<i64: 2>, scalar_prefetch = 0 : i64, scratch_operands = 0 : i64, tpu.core_type = #tpu.core_type<tc>, window_params = [{transform_indices = @transform_0, window_bounds = array<i64: 1, 16, 16, 8>}, {pipeline_mode = #tpu.pipeline_mode<synchronous>, transform_indices = @transform_1, window_bounds = array<i64: 8, 16>}, {pipeline_mode = #tpu.pipeline_mode<synchronous>, transform_indices = @transform_2, window_bounds = array<i64: 1, 16>}, {transform_indices = @transform_3, window_bounds = array<i64: 1, 16, 2, 16, 8>}]} {
    %c0 = arith.constant 0 : index
    %c0_0 = arith.constant 0 : index
    %c0_1 = arith.constant 0 : index
    %c0_2 = arith.constant 0 : index
    %0 = vector.load %arg1[%c0, %c0_0, %c0_1, %c0_2] : memref<1x16x16x8xf32, #tpu.memory_space<vmem>>, vector<1x16x16x8xf32>
    %1 = vector.shape_cast %0 : vector<1x16x16x8xf32> to vector<16x16x8xf32>
    %2 = vector.shape_cast %1 : vector<16x16x8xf32> to vector<256x8xf32>
    %c0_3 = arith.constant 0 : index
    %c0_4 = arith.constant 0 : index
    %3 = vector.load %arg2[%c0_3, %c0_4] : memref<8x16xf32, #tpu.memory_space<vmem>>, vector<8x16xf32>
    %cst = arith.constant dense<0.000000e+00> : vector<256x16xf32>
    %4 = tpu.matmul %2, %3, %cst {dimension_numbers = #tpu.dot_dimension_numbers<[1], [0], [0], [1], [0, 0, 1, 1], [], []>} : vector<256x8xf32>, vector<8x16xf32>, vector<256x16xf32> -> vector<256x16xf32>
    %c0_5 = arith.constant 0 : index
    %c0_6 = arith.constant 0 : index
    %5 = vector.load %arg3[%c0_5, %c0_6] : memref<1x16xf32, #tpu.memory_space<vmem>>, vector<1x16xf32>
    %6 = vector.broadcast %5 : vector<1x16xf32> to vector<256x16xf32>
    %7 = arith.addf %4, %6 : vector<256x16xf32>
    %8 = vector.extract_strided_slice %7 {offsets = [0, 0], sizes = [256, 8], strides = [1, 1]} : vector<256x16xf32> to vector<256x8xf32>
    %9 = vector.shape_cast %8 : vector<256x8xf32> to vector<16x16x8xf32>
    %c0_7 = arith.constant 0 : index
    %c0_8 = arith.constant 0 : index
    %c0_9 = arith.constant 0 : index
    %c0_10 = arith.constant 0 : index
    %c0_11 = arith.constant 0 : index
    %10 = vector.load %arg4[%c0_7, %c0_8, %c0_9, %c0_10, %c0_11] : memref<1x16x2x16x8xf32, #tpu.memory_space<vmem>>, vector<1x16x1x16x8xf32>
    %11 = vector.shape_cast %10 : vector<1x16x1x16x8xf32> to vector<16x16x8xf32>
    %12 = vector.shape_cast %9 : vector<16x16x8xf32> to vector<1x16x1x16x8xf32>
    tpu.vector_store %arg4[%c0_7, %c0_8, %c0_9, %c0_10, %c0_11], %12 {strides = array<i32>} : memref<1x16x2x16x8xf32, #tpu.memory_space<vmem>>, vector<1x16x1x16x8xf32>,
    %13 = vector.extract_strided_slice %7 {offsets = [0, 8], sizes = [256, 8], strides = [1, 1]} : vector<256x16xf32> to vector<256x8xf32>
    %14 = vector.shape_cast %13 : vector<256x8xf32> to vector<16x16x8xf32>
    %c0_12 = arith.constant 0 : index
    %c0_13 = arith.constant 0 : index
    %c1 = arith.constant 1 : index
    %c0_14 = arith.constant 0 : index
    %c0_15 = arith.constant 0 : index
    %15 = vector.load %arg4[%c0_12, %c0_13, %c1, %c0_14, %c0_15] : memref<1x16x2x16x8xf32, #tpu.memory_space<vmem>>, vector<1x16x1x16x8xf32>
    %16 = vector.shape_cast %15 : vector<1x16x1x16x8xf32> to vector<16x16x8xf32>
    %17 = vector.shape_cast %14 : vector<16x16x8xf32> to vector<1x16x1x16x8xf32>
    tpu.vector_store %arg4[%c0_12, %c0_13, %c1, %c0_14, %c0_15], %17 {strides = array<i32>} : memref<1x16x2x16x8xf32, #tpu.memory_space<vmem>>, vector<1x16x1x16x8xf32>,
    return
  }
  func.func @transform_0(%arg0: i32) -> (i32, i32, i32, i32) {
    %c0_i32 = arith.constant 0 : i32
    %c0_i32_0 = arith.constant 0 : i32
    %c0_i32_1 = arith.constant 0 : i32
    %c0_i32_2 = arith.constant 0 : i32
    return %arg0, %c0_i32, %c0_i32_0, %c0_i32_1 : i32, i32, i32, i32
  }
  func.func @transform_1(%arg0: i32) -> (i32, i32) {
    %c0_i32 = arith.constant 0 : i32
    %c0_i32_0 = arith.constant 0 : i32
    %c0_i32_1 = arith.constant 0 : i32
    return %c0_i32, %c0_i32_0 : i32, i32
  }
  func.func @transform_2(%arg0: i32) -> (i32, i32) {
    %c0_i32 = arith.constant 0 : i32
    %c0_i32_0 = arith.constant 0 : i32
    %c0_i32_1 = arith.constant 0 : i32
    return %c0_i32, %c0_i32_0 : i32, i32
  }
  func.func @transform_3(%arg0: i32) -> (i32, i32, i32, i32, i32) {
    %c0_i32 = arith.constant 0 : i32
    %c0_i32_0 = arith.constant 0 : i32
    %c0_i32_1 = arith.constant 0 : i32
    %c0_i32_2 = arith.constant 0 : i32
    %c0_i32_3 = arith.constant 0 : i32
    return %arg0, %c0_i32, %c0_i32_0, %c0_i32_1, %c0_i32_2 : i32, i32, i32, i32, i32
  }
}

</mosaic_0001>

<bundles_post_ra>
// kernel: tpu_custom_call.1
= control target key start
LH: loop header
LB: loop body
LE: loop exit
PB: predicated region body
PF: predicated region fallthrough
CT: control target
= control target key end

     0   :  { %s785_s12 = smov 0   ;;  %s1074_s0 = inlined_call_operand.vmem [shape: f32[2,16,16,8], index: 0, kind: input, shape index: {}]   ;;  %s1075_s1 = inlined_call_operand.vmem [shape: f32[8,16], index: 1, kind: input, shape index: {}]   ;;  %s1076_s2 = inlined_call_operand.vmem [shape: f32[1,16], index: 2, kind: input, shape index: {}]   ;;  %s1077_s3 = inlined_call_operand.vmem [shape: f32[2,16,2,16,8], index: 3, kind: output, shape index: {}]  }
   0x1 LB: > { %s666_s13 = sadd.s32 4294967295, %s762_s12   ;;  %p670_p0 = scmp.ge.s32.totalorder %s762_s12, 1  ;;  %s762_s12 = sphi %s785_s12, %s13_s12  }
   0x2   : > { %p137_p1 = scmp.lt.s32.totalorder %s762_s12, 3 }
   0x4   : > { %p138_p2 = pnand %p670_p0, %p137_p1 }
   0x5   : > { %p161_p3 = scmp.lt.s32.totalorder (!%p138_p2), %s666_s13, 1  ;;  %s764_s26 = smov (!%p138_p2), 120  }
   0x6   : > { %141 = sbr.rel (%p138_p2) target bundleno = 347 (0x15b), region = 32 }
   0xb   : > { %v203_v0 = vld [vmem:[%s1075_s1] sm:$0xff]  ;;  %s1079_s13 = smov (!%p161_p3, %s666_s13), 1  ;;  %vm208_vm0 = vcmask 64512  }
   0xc   : > { %320 = vmatpush.msra.mxu0 %v203_v0  ;;  %744 = vmatpush.msra.mxu2 %v203_v0  ;;  %s741_s16 = sshll.u32 %s1079_s13, 8  ;;  %s742_s20 = sshll.u32 %s1079_s13, 9  ;;  %v872_v33 = vld [vmem:[%s1076_s2] ss:$0 sm:$0xff] }
   0xd   : > { %745 = vmatpush.msra.mxu3 %v203_v0  ;;  %743 = vmatpush.msra.mxu1 %v203_v0  ;;  %s802_s19 = scalar_lea.vmem %s1074_s0, %s741_s16  ;;  %s877_s25 = scalar_lea.vmem %s1077_s3, %s742_s20 }
   0xe   : > { %v171_v1 = vld [vmem:[%s802_s19] sm:$0xff]  ;;  %v188_v5 = vld [vmem:[%s802_s19 + $0x88] sm:$0xff]  ;;  %v173_v9 = vld [vmem:[%s802_s19 + $0x10] sm:$0xff] }
   0xf   : > { %v187_v2 = vld [vmem:[%s802_s19 + $0x80] sm:$0xff]  ;;  %675 = vmatmul.msk.f32.vlgmr.msra.gmra.mxu0 %vm208_vm0, %v171_v1  ;;  %v172_v6 = vld [vmem:[%s802_s19 + $0x8] sm:$0xff]  ;;  %v189_v10 = vld [vmem:[%s802_s19 + $0x90] sm:$0xff] }
  0x10   : > { %v195_v3 = vld [vmem:[%s802_s19 + $0xc0] sm:$0xff]  ;;  %691 = vmatmul.msk.f32.vlgmr.msra.gmra.mxu2 %vm208_vm0, %v187_v2  ;;  %v196_v7 = vld [vmem:[%s802_s19 + $0xc8] sm:$0xff]  ;;  %v197_v11 = vld [vmem:[%s802_s19 + $0xd0] sm:$0xff] }
  0x11   : > { %v179_v4 = vld [vmem:[%s802_s19 + $0x40] sm:$0xff]  ;;  %699 = vmatmul.msk.f32.vlgmr.msra.gmra.mxu3 %vm208_vm0, %v195_v3  ;;  %v180_v8 = vld [vmem:[%s802_s19 + $0x48] sm:$0xff]  ;;  %v181_v12 = vld [vmem:[%s802_s19 + $0x50] sm:$0xff] }
  0x12   : > { %683 = vmatmul.msk.f32.vlgmr.msra.gmra.mxu1 %vm208_vm0, %v179_v4  ;;  %v174_v13 = vld [vmem:[%s802_s19 + $0x18] sm:$0xff]  ;;  %v175_v17 = vld [vmem:[%s802_s19 + $0x20] sm:$0xff]  ;;  %v192_v21 = vld [vmem:[%s802_s19 + $0xa8] sm:$0xff] }
  0x13   : > { %v190_v14 = vld [vmem:[%s802_s19 + $0x98] sm:$0xff]  ;;  %v191_v18 = vld [vmem:[%s802_s19 + $0xa0] sm:$0xff]  ;;  %v176_v22 = vld [vmem:[%s802_s19 + $0x28] sm:$0xff] }
  0x14   : > { %v182_v15 = vld [vmem:[%s802_s19 + $0x58] sm:$0xff]  ;;  %v183_v19 = vld [vmem:[%s802_s19 + $0x60] sm:$0xff]  ;;  %v184_v23 = vld [vmem:[%s802_s19 + $0x68] sm:$0xff] }
  0x15   : > { %v198_v16 = vld [vmem:[%s802_s19 + $0xd8] sm:$0xff]  ;;  %v199_v20 = vld [vmem:[%s802_s19 + $0xe0] sm:$0xff]  ;;  %v200_v24 = vld [vmem:[%s802_s19 + $0xe8] sm:$0xff] }
  0x16   : > { %v193_v25 = vld [vmem:[%s802_s19 + $0xb0] sm:$0xff]  ;;  %v194_v29 = vld [vmem:[%s802_s19 + $0xb8] sm:$0xff] }
  0x17   : > { %676 = vmatmul.msk.f32.gmra.mxu0 %vm208_vm0, %v172_v6  ;;  %v177_v26 = vld [vmem:[%s802_s19 + $0x30] sm:$0xff]  ;;  %v178_v30 = vld [vmem:[%s802_s19 + $0x38] sm:$0xff] }
  0x18   : > { %692 = vmatmul.msk.f32.gmra.mxu2 %vm208_vm0, %v188_v5  ;;  %v185_v27 = vld [vmem:[%s802_s19 + $0x70] sm:$0xff]  ;;  %v186_v31 = vld [vmem:[%s802_s19 + $0x78] sm:$0xff] }
  0x19   : > { %700 = vmatmul.msk.f32.gmra.mxu3 %vm208_vm0, %v196_v7  ;;  %v201_v28 = vld [vmem:[%s802_s19 + $0xf0] sm:$0xff]  ;;  %v202_v32 = vld [vmem:[%s802_s19 + $0xf8] sm:$0xff] }
  0x1a   : > { %684 = vmatmul.msk.f32.gmra.mxu1 %vm208_vm0, %v180_v8 }
  0x1f   : > { %677 = vmatmul.msk.f32.gmra.mxu0 %vm208_vm0, %v173_v9 }
  0x20   : > { %693 = vmatmul.msk.f32.gmra.mxu2 %vm208_vm0, %v189_v10 }
  0x21   : > { %701 = vmatmul.msk.f32.gmra.mxu3 %vm208_vm0, %v197_v11 }
  0x22   : > { %685 = vmatmul.msk.f32.gmra.mxu1 %vm208_vm0, %v181_v12 }
  0x27   : > { %678 = vmatmul.msk.f32.gmra.mxu0 %vm208_vm0, %v174_v13 }
  0x28   : > { %694 = vmatmul.msk.f32.gmra.mxu2 %vm208_vm0, %v190_v14 }
  0x29   : > { %702 = vmatmul.msk.f32.gmra.mxu3 %vm208_vm0, %v198_v16 }
  0x2a   : > { %686 = vmatmul.msk.f32.gmra.mxu1 %vm208_vm0, %v182_v15 }
  0x2f   : > { %679 = vmatmul.msk.f32.gmra.mxu0 %vm208_vm0, %v175_v17 }
  0x30   : > { %695 = vmatmul.msk.f32.gmra.mxu2 %vm208_vm0, %v191_v18 }
  0x31   : > { %703 = vmatmul.msk.f32.gmra.mxu3 %vm208_vm0, %v199_v20 }
  0x32   : > { %687 = vmatmul.msk.f32.gmra.mxu1 %vm208_vm0, %v183_v19 }
  0x37   : > { %680 = vmatmul.msk.f32.gmra.mxu0 %vm208_vm0, %v176_v22 }
  0x38   : > { %696 = vmatmul.msk.f32.gmra.mxu2 %vm208_vm0, %v192_v21 }
  0x39   : > { %704 = vmatmul.msk.f32.gmra.mxu3 %vm208_vm0, %v200_v24 }
  0x3a   : > { %688 = vmatmul.msk.f32.gmra.mxu1 %vm208_vm0, %v184_v23 }
  0x3f   : > { %681 = vmatmul.msk.f32.gmra.mxu0 %vm208_vm0, %v177_v26 }
  0x40   : > { %697 = vmatmul.msk.f32.gmra.mxu2 %vm208_vm0, %v193_v25 }
  0x41   : > { %705 = vmatmul.msk.f32.gmra.mxu3 %vm208_vm0, %v201_v28 }
  0x42   : > { %689 = vmatmul.msk.f32.gmra.mxu1 %vm208_vm0, %v185_v27 }
  0x47   : > { %682 = vmatmul.msk.f32.gmra.mxu0 %vm208_vm0, %v178_v30 }
  0x48   : > { %698 = vmatmul.msk.f32.gmra.mxu2 %vm208_vm0, %v194_v29 }
  0x49   : > { %706 = vmatmul.msk.f32.gmra.mxu3 %vm208_vm0, %v202_v32 }
  0x4a   : > { %690 = vmatmul.msk.f32.gmra.mxu1 %vm208_vm0, %v186_v31 }
  0x8c   : > { %v322_v34 = vpop.f32.mrf.mxu0 }
  0x8d   : > { %v323_v35 = vadd.f32 %v872_v33, %v322_v34 }
  0x8f   : > { %v346_v36 = vpop.f32.mrf.mxu1  ;;  %418 = vst.msk [vmem:[%s877_s25] sm:$0xff] %vm208_vm0, %v323_v35  ;;  %482 = vrot.lane.b32.xlu0 %v323_v35, %s764_s26 }
  0x90   : > { %v347_v37 = vadd.f32 %v872_v33, %v346_v36 }
  0x92   : > { %426 = vst.msk [vmem:[%s877_s25 + $0x80] sm:$0xff] %vm208_vm0, %v347_v37  ;;  %498 = vrot.lane.b32.xlu2 %v347_v37, %s764_s26 }
  0x93   : > { %v370_v38 = vpop.f32.mrf.mxu2 }
  0x94   : > { %v371_v39 = vadd.f32 %v872_v33, %v370_v38  ;;  %v394_v40 = vpop.f32.mrf.mxu3  ;;  %v325_v42 = vpop.f32.mrf.mxu0 }
  0x95   : > { %v395_v41 = vadd.f32 %v872_v33, %v394_v40  ;;  %v326_v43 = vadd.f32 %v872_v33, %v325_v42 }
  0x96   : > { %434 = vst.msk [vmem:[%s877_s25 + $0x100] sm:$0xff] %vm208_vm0, %v371_v39  ;;  %514 = vrot.lane.b32.xlu1 %v371_v39, %s764_s26 }
  0x97   : > { %v349_v44 = vpop.f32.mrf.mxu1  ;;  %442 = vst.msk [vmem:[%s877_s25 + $0x180] sm:$0xff] %vm208_vm0, %v395_v41  ;;  %530 = vrot.lane.b32.xlu0 %v395_v41, %s764_s26 }
  0x98   : > { %v350_v45 = vadd.f32 %v872_v33, %v349_v44  ;;  %419 = vst.msk [vmem:[%s877_s25 + $0x8] sm:$0xff] %vm208_vm0, %v326_v43 }
  0x9a   : > { %427 = vst.msk [vmem:[%s877_s25 + $0x88] sm:$0xff] %vm208_vm0, %v350_v45 }
  0x9b   : > { %v373_v46 = vpop.f32.mrf.mxu2 }
  0x9c   : > { %v374_v47 = vadd.f32 %v872_v33, %v373_v46  ;;  %v397_v48 = vpop.f32.mrf.mxu3  ;;  %v328_v50 = vpop.f32.mrf.mxu0 }
  0x9d   : > { %v398_v49 = vadd.f32 %v872_v33, %v397_v48  ;;  %v329_v51 = vadd.f32 %v872_v33, %v328_v50 }
  0x9e   : > { %435 = vst.msk [vmem:[%s877_s25 + $0x108] sm:$0xff] %vm208_vm0, %v374_v47  ;;  %516 = vrot.lane.b32.xlu2 %v374_v47, %s764_s26 }
  0x9f   : > { %v352_v52 = vpop.f32.mrf.mxu1  ;;  %443 = vst.msk [vmem:[%s877_s25 + $0x188] sm:$0xff] %vm208_vm0, %v398_v49  ;;  %532 = vrot.lane.b32.xlu1 %v398_v49, %s764_s26  ;;  %484 = vrot.lane.b32.xlu0 %v326_v43, %s764_s26 }
  0xa0   : > { %v353_v53 = vadd.f32 %v872_v33, %v352_v52  ;;  %420 = vst.msk [vmem:[%s877_s25 + $0x20] sm:$0xff] %vm208_vm0, %v329_v51 }
  0xa2   : > { %428 = vst.msk [vmem:[%s877_s25 + $0xa0] sm:$0xff] %vm208_vm0, %v353_v53 }
  0xa3   : > { %v376_v54 = vpop.f32.mrf.mxu2 }
  0xa4   : > { %v400_v55 = vpop.f32.mrf.mxu3  ;;  %v377_v56 = vadd.f32 %v872_v33, %v376_v54  ;;  %v331_v58 = vpop.f32.mrf.mxu0 }
  0xa5   : > { %v401_v57 = vadd.f32 %v872_v33, %v400_v55  ;;  %v332_v59 = vadd.f32 %v872_v33, %v331_v58 }
  0xa6   : > { %436 = vst.msk [vmem:[%s877_s25 + $0x120] sm:$0xff] %vm208_vm0, %v377_v56 }
  0xa7   : > { %v355_v60 = vpop.f32.mrf.mxu1  ;;  %444 = vst.msk [vmem:[%s877_s25 + $0x1a0] sm:$0xff] %vm208_vm0, %v401_v57  ;;  %534 = vrot.lane.b32.xlu2 %v401_v57, %s764_s26  ;;  %486 = vrot.lane.b32.xlu1 %v329_v51, %s764_s26 }
  0xa8   : > { %v356_v61 = vadd.f32 %v872_v33, %v355_v60  ;;  %500 = vrot.lane.b32.xlu0 %v350_v45, %s764_s26  ;;  %421 = vst.msk [vmem:[%s877_s25 + $0x28] sm:$0xff] %vm208_vm0, %v332_v59 }
  0xaa   : > { %429 = vst.msk [vmem:[%s877_s25 + $0xa8] sm:$0xff] %vm208_vm0, %v356_v61 }
  0xab   : > { %v379_v62 = vpop.f32.mrf.mxu2 }
  0xac   : > { %v380_v63 = vadd.f32 %v872_v33, %v379_v62  ;;  %v403_v0 = vpop.f32.mrf.mxu3  ;;  %v334_v1 = vpop.f32.mrf.mxu0 }
  0xad   : > { %v404_v2 = vadd.f32 %v872_v33, %v403_v0  ;;  %v335_v3 = vadd.f32 %v872_v33, %v334_v1 }
  0xae   : > { %437 = vst.msk [vmem:[%s877_s25 + $0x128] sm:$0xff] %vm208_vm0, %v380_v63 }
  0xaf   : > { %v358_v4 = vpop.f32.mrf.mxu1  ;;  %504 = vrot.lane.b32.xlu2 %v356_v61, %s764_s26  ;;  %502 = vrot.lane.b32.xlu1 %v353_v53, %s764_s26  ;;  %445 = vst.msk [vmem:[%s877_s25 + $0x1a8] sm:$0xff] %vm208_vm0, %v404_v2 }
  0xb0   : > { %v359_v5 = vadd.f32 %v872_v33, %v358_v4  ;;  %518 = vrot.lane.b32.xlu0 %v377_v56, %s764_s26  ;;  %422 = vst.msk [vmem:[%s877_s25 + $0x40] sm:$0xff] %vm208_vm0, %v335_v3 }
  0xb2   : > { %430 = vst.msk [vmem:[%s877_s25 + $0xc0] sm:$0xff] %vm208_vm0, %v359_v5 }
  0xb3   : > { %v382_v6 = vpop.f32.mrf.mxu2 }
  0xb4   : > { %v383_v7 = vadd.f32 %v872_v33, %v382_v6  ;;  %v406_v8 = vpop.f32.mrf.mxu3  ;;  %v337_v9 = vpop.f32.mrf.mxu0 }
  0xb5   : > { %v407_v10 = vadd.f32 %v872_v33, %v406_v8  ;;  %v338_v11 = vadd.f32 %v872_v33, %v337_v9 }
  0xb6   : > { %438 = vst.msk [vmem:[%s877_s25 + $0x140] sm:$0xff] %vm208_vm0, %v383_v7 }
  0xb7   : > { %v361_v12 = vpop.f32.mrf.mxu1  ;;  %490 = vrot.lane.b32.xlu2 %v335_v3, %s764_s26  ;;  %488 = vrot.lane.b32.xlu1 %v332_v59, %s764_s26  ;;  %446 = vst.msk [vmem:[%s877_s25 + $0x1c0] sm:$0xff] %vm208_vm0, %v407_v10 }
  0xb8   : > { %v362_v13 = vadd.f32 %v872_v33, %v361_v12  ;;  %536 = vrot.lane.b32.xlu0 %v404_v2, %s764_s26  ;;  %423 = vst.msk [vmem:[%s877_s25 + $0x48] sm:$0xff] %vm208_vm0, %v338_v11 }
  0xba   : > { %431 = vst.msk [vmem:[%s877_s25 + $0xc8] sm:$0xff] %vm208_vm0, %v362_v13 }
  0xbb   : > { %v385_v14 = vpop.f32.mrf.mxu2 }
  0xbc   : > { %v386_v15 = vadd.f32 %v872_v33, %v385_v14  ;;  %v409_v16 = vpop.f32.mrf.mxu3  ;;  %v340_v17 = vpop.f32.mrf.mxu0 }
  0xbd   : > { %v410_v18 = vadd.f32 %v872_v33, %v409_v16  ;;  %v341_v20 = vadd.f32 %v872_v33, %v340_v17 }
  0xbe   : > { %439 = vst.msk [vmem:[%s877_s25 + $0x148] sm:$0xff] %vm208_vm0, %v386_v15 }
  0xbf   : > { %v364_v19 = vpop.f32.mrf.mxu1  ;;  %522 = vrot.lane.b32.xlu2 %v383_v7, %s764_s26  ;;  %520 = vrot.lane.b32.xlu1 %v380_v63, %s764_s26  ;;  %447 = vst.msk [vmem:[%s877_s25 + $0x1c8] sm:$0xff] %vm208_vm0, %v410_v18 }
  0xc0   : > { %v365_v21 = vadd.f32 %v872_v33, %v364_v19  ;;  %506 = vrot.lane.b32.xlu0 %v359_v5, %s764_s26  ;;  %424 = vst.msk [vmem:[%s877_s25 + $0x60] sm:$0xff] %vm208_vm0, %v341_v20 }
  0xc2   : > { %432 = vst.msk [vmem:[%s877_s25 + $0xe0] sm:$0xff] %vm208_vm0, %v365_v21 }
  0xc3   : > { %v388_v22 = vpop.f32.mrf.mxu2 }
  0xc4   : > { %v389_v23 = vadd.f32 %v872_v33, %v388_v22  ;;  %v412_v24 = vpop.f32.mrf.mxu3  ;;  %v343_v25 = vpop.f32.mrf.mxu0 }
  0xc5   : > { %v413_v26 = vadd.f32 %v872_v33, %v412_v24  ;;  %v344_v28 = vadd.f32 %v872_v33, %v343_v25 }
  0xc6   : > { %440 = vst.msk [vmem:[%s877_s25 + $0x160] sm:$0xff] %vm208_vm0, %v389_v23 }
  0xc7   : > { %v367_v27 = vpop.f32.mrf.mxu1  ;;  %492 = vrot.lane.b32.xlu2 %v338_v11, %s764_s26  ;;  %538 = vrot.lane.b32.xlu1 %v407_v10, %s764_s26  ;;  %448 = vst.msk [vmem:[%s877_s25 + $0x1e0] sm:$0xff] %vm208_vm0, %v413_v26 }
  0xc8   : > { %v368_v29 = vadd.f32 %v872_v33, %v367_v27  ;;  %524 = vrot.lane.b32.xlu0 %v386_v15, %s764_s26  ;;  %425 = vst.msk [vmem:[%s877_s25 + $0x68] sm:$0xff] %vm208_vm0, %v344_v28 }
  0xca   : > { %433 = vst.msk [vmem:[%s877_s25 + $0xe8] sm:$0xff] %vm208_vm0, %v368_v29 }
  0xcb   : > { %v391_v30 = vpop.f32.mrf.mxu2 }
  0xcc   : > { %v392_v31 = vadd.f32 %v872_v33, %v391_v30  ;;  %v415_v32 = vpop.f32.mrf.mxu3 }
  0xcd   : > { %v416_v34 = vadd.f32 %v872_v33, %v415_v32 }
  0xce   : > { %441 = vst.msk [vmem:[%s877_s25 + $0x168] sm:$0xff] %vm208_vm0, %v392_v31 }
  0xcf   : > { %510 = vrot.lane.b32.xlu2 %v365_v21, %s764_s26  ;;  %508 = vrot.lane.b32.xlu1 %v362_v13, %s764_s26  ;;  %449 = vst.msk [vmem:[%s877_s25 + $0x1e8] sm:$0xff] %vm208_vm0, %v416_v34 }
  0xd0   : > { %494 = vrot.lane.b32.xlu0 %v341_v20, %s764_s26 }
  0xd7   : > { %528 = vrot.lane.b32.xlu2 %v392_v31, %s764_s26  ;;  %526 = vrot.lane.b32.xlu1 %v389_v23, %s764_s26 }
  0xd8   : > { %512 = vrot.lane.b32.xlu0 %v368_v29, %s764_s26 }
  0xdf   : > { %540 = vrot.lane.b32.xlu2 %v410_v18, %s764_s26  ;;  %496 = vrot.lane.b32.xlu1 %v344_v28, %s764_s26 }
  0xe0   : > { %542 = vrot.lane.b32.xlu0 %v413_v26, %s764_s26 }
  0xe7   : > { %544 = vrot.lane.b32.xlu1 %v416_v34, %s764_s26 }
  0xec   : > { %v499_v33 = vpop.permute.xlu2 %498 }
  0xed   : > { %715 = vst.msk [vmem:[%s877_s25 + $0x90] sm:$0xff] %vm208_vm0, %v499_v33 }
  0xf8   : > { %v517_v35 = vpop.permute.xlu2 %516 }
  0xf9   : > { %724 = vst.msk [vmem:[%s877_s25 + $0x118] sm:$0xff] %vm208_vm0, %v517_v35 }
 0x101   : > { %v535_v36 = vpop.permute.xlu2 %534  ;;  %v483_v37 = vpop.permute.xlu0 %482 }
 0x102   : > { %733 = vst.msk [vmem:[%s877_s25 + $0x1b0] sm:$0xff] %vm208_vm0, %v535_v36 }
 0x103   : > { %707 = vst.msk [vmem:[%s877_s25 + $0x10] sm:$0xff] %vm208_vm0, %v483_v37 }
 0x108   : > { %v515_v38 = vpop.permute.xlu1 %514 }
 0x109   : > { %723 = vst.msk [vmem:[%s877_s25 + $0x110] sm:$0xff] %vm208_vm0, %v515_v38  ;;  %v505_v39 = vpop.permute.xlu2 %504  ;;  %v531_v40 = vpop.permute.xlu0 %530 }
 0x10a   : > { %718 = vst.msk [vmem:[%s877_s25 + $0xb8] sm:$0xff] %vm208_vm0, %v505_v39 }
 0x10b   : > { %731 = vst.msk [vmem:[%s877_s25 + $0x190] sm:$0xff] %vm208_vm0, %v531_v40 }
 0x111   : > { %v533_v41 = vpop.permute.xlu1 %532  ;;  %v491_v42 = vpop.permute.xlu2 %490 }
 0x112   : > { %732 = vst.msk [vmem:[%s877_s25 + $0x198] sm:$0xff] %vm208_vm0, %v533_v41  ;;  %v485_v43 = vpop.permute.xlu0 %484 }
 0x113   : > { %711 = vst.msk [vmem:[%s877_s25 + $0x50] sm:$0xff] %vm208_vm0, %v491_v42 }
 0x114   : > { %708 = vst.msk [vmem:[%s877_s25 + $0x18] sm:$0xff] %vm208_vm0, %v485_v43 }
 0x119   : > { %v523_v44 = vpop.permute.xlu2 %522  ;;  %v487_v45 = vpop.permute.xlu1 %486 }
 0x11a   : > { %727 = vst.msk [vmem:[%s877_s25 + $0x150] sm:$0xff] %vm208_vm0, %v523_v44  ;;  %v501_v46 = vpop.permute.xlu0 %500 }
 0x11b   : > { %709 = vst.msk [vmem:[%s877_s25 + $0x30] sm:$0xff] %vm208_vm0, %v487_v45 }
 0x11c   : > { %716 = vst.msk [vmem:[%s877_s25 + $0x98] sm:$0xff] %vm208_vm0, %v501_v46 }
 0x121   : > { %v493_v47 = vpop.permute.xlu2 %492  ;;  %v503_v48 = vpop.permute.xlu1 %502 }
 0x122   : > { %712 = vst.msk [vmem:[%s877_s25 + $0x58] sm:$0xff] %vm208_vm0, %v493_v47  ;;  %v519_v49 = vpop.permute.xlu0 %518 }
 0x123   : > { %717 = vst.msk [vmem:[%s877_s25 + $0xb0] sm:$0xff] %vm208_vm0, %v503_v48 }
 0x124   : > { %725 = vst.msk [vmem:[%s877_s25 + $0x130] sm:$0xff] %vm208_vm0, %v519_v49 }
 0x129   : > { %v511_v50 = vpop.permute.xlu2 %510  ;;  %v489_v51 = vpop.permute.xlu1 %488 }
 0x12a   : > { %721 = vst.msk [vmem:[%s877_s25 + $0xf0] sm:$0xff] %vm208_vm0, %v511_v50  ;;  %v537_v52 = vpop.permute.xlu0 %536 }
 0x12b   : > { %710 = vst.msk [vmem:[%s877_s25 + $0x38] sm:$0xff] %vm208_vm0, %v489_v51 }
 0x12c   : > { %734 = vst.msk [vmem:[%s877_s25 + $0x1b8] sm:$0xff] %vm208_vm0, %v537_v52 }
 0x131   : > { %v529_v53 = vpop.permute.xlu2 %528  ;;  %v521_v54 = vpop.permute.xlu1 %520 }
 0x132   : > { %730 = vst.msk [vmem:[%s877_s25 + $0x178] sm:$0xff] %vm208_vm0, %v529_v53  ;;  %v507_v55 = vpop.permute.xlu0 %506 }
 0x133   : > { %726 = vst.msk [vmem:[%s877_s25 + $0x138] sm:$0xff] %vm208_vm0, %v521_v54 }
 0x134   : > { %719 = vst.msk [vmem:[%s877_s25 + $0xd0] sm:$0xff] %vm208_vm0, %v507_v55 }
 0x139   : > { %v541_v56 = vpop.permute.xlu2 %540  ;;  %v539_v57 = vpop.permute.xlu1 %538 }
 0x13a   : > { %736 = vst.msk [vmem:[%s877_s25 + $0x1d8] sm:$0xff] %vm208_vm0, %v541_v56  ;;  %v525_v58 = vpop.permute.xlu0 %524 }
 0x13b   : > { %735 = vst.msk [vmem:[%s877_s25 + $0x1d0] sm:$0xff] %vm208_vm0, %v539_v57 }
 0x13c   : > { %728 = vst.msk [vmem:[%s877_s25 + $0x158] sm:$0xff] %vm208_vm0, %v525_v58 }
 0x141   : > { %v509_v59 = vpop.permute.xlu1 %508 }
 0x142   : > { %720 = vst.msk [vmem:[%s877_s25 + $0xd8] sm:$0xff] %vm208_vm0, %v509_v59  ;;  %v495_v60 = vpop.permute.xlu0 %494 }
 0x143   : > { %713 = vst.msk [vmem:[%s877_s25 + $0x70] sm:$0xff] %vm208_vm0, %v495_v60 }
 0x149   : > { %v527_v61 = vpop.permute.xlu1 %526 }
 0x14a   : > { %729 = vst.msk [vmem:[%s877_s25 + $0x170] sm:$0xff] %vm208_vm0, %v527_v61  ;;  %v513_v62 = vpop.permute.xlu0 %512 }
 0x14b   : > { %722 = vst.msk [vmem:[%s877_s25 + $0xf8] sm:$0xff] %vm208_vm0, %v513_v62 }
 0x151   : > { %v497_v63 = vpop.permute.xlu1 %496 }
 0x152   : > { %714 = vst.msk [vmem:[%s877_s25 + $0x78] sm:$0xff] %vm208_vm0, %v497_v63  ;;  %v543_v0 = vpop.permute.xlu0 %542 }
 0x153   : > { %737 = vst.msk [vmem:[%s877_s25 + $0x1f0] sm:$0xff] %vm208_vm0, %v543_v0 }
 0x159   : > { %v545_v1 = vpop.permute.xlu1 %544 }
 0x15a   : > { %738 = vst.msk [vmem:[%s877_s25 + $0x1f8] sm:$0xff] %vm208_vm0, %v545_v1 }
 0x15b PF: > { %s13_s12 = sadd.s32 1, %s762_s12  }
 0x15c   : > { %p10_p4 = scmp.ge.s32.totalorder %s13_s12, 4  }
 0x15e   :  { %12 = sbr.rel (!%p10_p4) target bundleno = 1 (0x1), region = 63 }

</bundles_post_ra>
